<compile_context>
chip_gen: v5e
topology: v5e:2x2
jax: 0.10.0
libtpu: 0.0.40
codegen_flags: <defaults>
</compile_context>

<pallas_src>
import functools

import jax
import jax.numpy as jnp
from jax import lax
from jax.experimental import pallas as pl
from jax.experimental.pallas import tpu as pltpu

KH, KW = 3, 3
WINDOW_SIZE = float(KH * KW)


def _partial_conv_kernel(x_ref, m_ref, w_ref, b_ref, out_ref, omask_ref,
                         *, h, w, matmul_dtype):
    # x_ref    : (1, Cin, H*W)       unpadded input, spatial flattened (lane axis)
    # m_ref    : (1, Cin, H*W)       unpadded mask
    # w_ref    : (Cout, 9*Cin)       per-tap weights, tap-major [(ky,kx) x Cin]
    # b_ref    : (Cout, 1)           input_conv bias
    # out_ref  : (1, Cout, H*W)      output (already unpadded / lane-dense)
    # omask_ref: (1, 1,   H*W)       single-channel clipped output mask
    hw = h * w

    x = x_ref[0]                                  # (Cin, HW)
    m = m_ref[0]                                  # (Cin, HW)
    xm = x * m                                    # fused input*mask on the VPU
    msum = jnp.sum(m, axis=0, keepdims=True)      # (1, HW): mask reduced over Cin once

    # Column index of every flat position (for the two column-wrap masks).
    col = lax.broadcasted_iota(jnp.int32, (1, hw), 1) % w
    not_first = (col != 0).astype(jnp.float32)        # zero col==0   (used by dx=+1 taps)
    not_last = (col != (w - 1)).astype(jnp.float32)   # zero col==W-1 (used by dx=-1 taps)

    # Cast ONCE (hoisted out of the tap loop).  Three column-masked variants:
    # a tap with horizontal offset dx fetches xm_flat[i + dy*W + dx]; wrapped
    # fetches always land on source column 0 (dx=+1) or W-1 (dx=-1), so zeroing
    # those source columns makes the flat-shift fetch exactly equal to the
    # zero-padded convolution window.
    xm_c = xm.astype(matmul_dtype)                    # dx =  0
    xm_l = (xm * not_last).astype(matmul_dtype)       # dx = -1
    xm_r = (xm * not_first).astype(matmul_dtype)      # dx = +1

    pad = w + 1                                   # covers shifts |dy*W + dx| <= W+1

    def ext(v):
        z = jnp.zeros((v.shape[0], pad), v.dtype)
        return jnp.concatenate([z, v, z], axis=1)  # (rows, HW + 2*pad)

    xm_ext = {-1: ext(xm_l), 0: ext(xm_c), 1: ext(xm_r)}
    ms_ext = {-1: ext(msum * not_last), 0: ext(msum), 1: ext(msum * not_first)}

    # Build the stacked (9*Cin, HW) matmul operand (one big K=9*Cin MXU matmul
    # instead of 9 tiny K=Cin ones) and the mask window sum (cheap VPU adds on
    # a (1, HW) operand).
    tap_list = []
    macc = jnp.zeros((1, hw), jnp.float32)
    for ky in range(KH):
        dy = ky - 1
        for kx in range(KW):
            dx = kx - 1
            start = pad + dy * w + dx             # static, in-bounds by construction
            tap_list.append(xm_ext[dx][:, start:start + hw])
            macc = macc + ms_ext[dx][:, start:start + hw]
    taps = jnp.concatenate(tap_list, axis=0)      # (9*Cin, HW)

    acc = jnp.dot(w_ref[...], taps, preferred_element_type=jnp.float32)  # (Cout, HW)

    out = acc + b_ref[...]                        # bias broadcast (Cout, 1)
    omask = jnp.clip(macc, 0.0, 1.0)
    mask_ratio = (WINDOW_SIZE * pl.reciprocal(macc + 1e-8, approx=False)) * omask

    out_ref[...] = (out * mask_ratio)[None]       # (1, Cout, HW), lane-dense store
    omask_ref[...] = omask[None]                  # (1, 1, HW), single channel


def _pick_vmem_limit():
    """Per-generation VMEM budget with headroom (48 MiB on v7x, ~96 MiB on v5e/v6e)."""
    cap = 128 * 1024 * 1024
    try:
        cap = int(getattr(pltpu.get_tpu_info(), "vmem_capacity_bytes", cap))
    except Exception:
        pass
    return int(min(cap * 3 // 4, 100 * 1024 * 1024))


def partial_conv(x_nchw, mask_nchw, weight_oihw, bias, *, matmul_dtype=jnp.float32):
    """Partial convolution forward.

    x_nchw, mask_nchw : (N, Cin, H, W) float32
    weight_oihw       : (Cout, Cin, 3, 3) float32
    bias              : (Cout,) float32
    Returns (output, output_mask), both (N, Cout, H, W) float32 (NCHW).
    """
    N, Cin, H, W = x_nchw.shape
    Cout = weight_oihw.shape[0]
    HW = H * W

    # Free reshapes (merge contiguous trailing dims): no HBM copy, no padding.
    xf = x_nchw.reshape(N, Cin, HW)
    mf = mask_nchw.reshape(N, Cin, HW)

    # (Cout, Cin, KH, KW) -> (Cout, KH, KW, Cin) -> (Cout, 9*Cin), tap-major to
    # match the in-kernel tap stacking order.
    w_stack = jnp.transpose(weight_oihw, (0, 2, 3, 1)).reshape(Cout, KH * KW * Cin)
    w_stack = w_stack.astype(matmul_dtype)
    b2 = bias.reshape(Cout, 1)

    kernel = functools.partial(_partial_conv_kernel, h=H, w=W,
                               matmul_dtype=matmul_dtype)

    out_flat, omask_flat = pl.pallas_call(
        kernel,
        out_shape=(
            jax.ShapeDtypeStruct((N, Cout, HW), jnp.float32),
            jax.ShapeDtypeStruct((N, 1, HW), jnp.float32),
        ),
        grid_spec=pltpu.PrefetchScalarGridSpec(
            num_scalar_prefetch=0,
            grid=(N,),
            in_specs=[
                pl.BlockSpec((1, Cin, HW), lambda n: (n, 0, 0)),
                pl.BlockSpec((1, Cin, HW), lambda n: (n, 0, 0)),
                pl.BlockSpec((Cout, KH * KW * Cin), lambda n: (0, 0)),
                pl.BlockSpec((Cout, 1), lambda n: (0, 0)),
            ],
            out_specs=[
                pl.BlockSpec((1, Cout, HW), lambda n: (n, 0, 0)),
                pl.BlockSpec((1, 1, HW), lambda n: (n, 0, 0)),
            ],
        ),
        compiler_params=pltpu.CompilerParams(
            dimension_semantics=("parallel",),
            vmem_limit_bytes=_pick_vmem_limit(),
        ),
    )(xf, mf, w_stack, b2)

    # Free reshape back to NCHW; no garbage columns, no slice copy.
    out = out_flat.reshape(N, Cout, H, W)
    omask = jnp.broadcast_to(omask_flat.reshape(N, 1, H, W), (N, Cout, H, W))
    return out, omask


def _reference(x, mask, weight, bias):
    """Pure-JAX reference (lax conv) mirroring the PyTorch module."""
    dn = ("NCHW", "OIHW", "NCHW")
    conv = lambda inp, w: lax.conv_general_dilated(
        inp, w, window_strides=(1, 1), padding=((1, 1), (1, 1)),
        dimension_numbers=dn)
    out = conv(x * mask, weight) + bias.reshape(1, -1, 1, 1)
    out_mask = conv(mask, jnp.ones_like(weight))
    mask_ratio = WINDOW_SIZE / (out_mask + 1e-8)
    out_mask_c = jnp.clip(out_mask, 0.0, 1.0)
    mask_ratio = mask_ratio * out_mask_c
    return out * mask_ratio, out_mask_c


if __name__ == "__main__":
    key = jax.random.PRNGKey(0)
    k1, k2, k3, k4 = jax.random.split(key, 4)

    N, Cin, Cout, H, W = 2, 4, 8, 16, 16

    x = jax.random.normal(k1, (N, Cin, H, W), dtype=jnp.float32)
    # binary-ish mask with some zero holes
    mask = (jax.random.uniform(k2, (N, Cin, H, W)) > 0.3).astype(jnp.float32)

    # Deterministic synthetic parameters (module __init__ shapes).
    weight = 0.1 * jax.random.normal(k3, (Cout, Cin, KH, KW), dtype=jnp.float32)
    bias = 0.05 * jax.random.normal(k4, (Cout,), dtype=jnp.float32)

    out, out_mask = partial_conv(x, mask, weight, bias)
    out, out_mask = jax.block_until_ready((out, out_mask))

    ref_out, ref_mask = _reference(x, mask, weight, bias)
    assert out.shape == (N, Cout, H, W) and out_mask.shape == (N, Cout, H, W)
    assert jnp.allclose(out, ref_out, atol=1e-4, rtol=1e-4)
    assert jnp.allclose(out_mask, ref_mask, atol=1e-5, rtol=1e-5)

    print("KERNEL_OK")
</pallas_src>

<mosaic_0001>
module attributes {stable_mosaic.version = 11 : i64} {
  func.func @_partial_conv_kernel(%arg0: i32, %arg1: memref<1x4x256xf32, #tpu.memory_space<vmem>>, %arg2: memref<1x4x256xf32, #tpu.memory_space<vmem>>, %arg3: memref<8x36xf32, #tpu.memory_space<vmem>>, %arg4: memref<8x1xf32, #tpu.memory_space<vmem>>, %arg5: memref<1x8x256xf32, #tpu.memory_space<vmem>>, %arg6: memref<1x1x256xf32, #tpu.memory_space<vmem>>) attributes {dimension_semantics = [#tpu.dimension_semantics<parallel>], iteration_bounds = array<i64: 2>, scalar_prefetch = 0 : i64, scratch_operands = 0 : i64, tpu.core_type = #tpu.core_type<tc>, window_params = [{transform_indices = @transform_0, window_bounds = array<i64: 1, 4, 256>}, {transform_indices = @transform_1, window_bounds = array<i64: 1, 4, 256>}, {pipeline_mode = #tpu.pipeline_mode<synchronous>, transform_indices = @transform_2, window_bounds = array<i64: 8, 36>}, {pipeline_mode = #tpu.pipeline_mode<synchronous>, transform_indices = @transform_3, window_bounds = array<i64: 8, 1>}, {transform_indices = @transform_4, window_bounds = array<i64: 1, 8, 256>}, {transform_indices = @transform_5, window_bounds = array<i64: 1, 1, 256>}]} {
    %c0 = arith.constant 0 : index
    %c0_0 = arith.constant 0 : index
    %c0_1 = arith.constant 0 : index
    %0 = vector.load %arg1[%c0, %c0_0, %c0_1] : memref<1x4x256xf32, #tpu.memory_space<vmem>>, vector<1x4x256xf32>
    %1 = vector.shape_cast %0 : vector<1x4x256xf32> to vector<4x256xf32>
    %c0_2 = arith.constant 0 : index
    %c0_3 = arith.constant 0 : index
    %c0_4 = arith.constant 0 : index
    %2 = vector.load %arg2[%c0_2, %c0_3, %c0_4] : memref<1x4x256xf32, #tpu.memory_space<vmem>>, vector<1x4x256xf32>
    %3 = vector.shape_cast %2 : vector<1x4x256xf32> to vector<4x256xf32>
    %4 = arith.mulf %1, %3 : vector<4x256xf32>
    %cst = arith.constant dense<0.000000e+00> : vector<256xf32>
    %5 = vector.multi_reduction <add>, %3, %cst [0] : vector<4x256xf32> to vector<256xf32>
    %6 = vector.shape_cast %5 : vector<256xf32> to vector<1x256xf32>
    %7 = tpu.iota {dimensions = array<i32: 1>} : vector<1x256xi32>
    %c16_i32 = arith.constant 16 : i32
    %c0_i32 = arith.constant 0 : i32
    %8 = arith.cmpi eq, %c16_i32, %c0_i32 : i32
    %c1_i32 = arith.constant 1 : i32
    %9 = arith.select %8, %c1_i32, %c16_i32 : i32
    %10 = vector.broadcast %9 : i32 to vector<1x256xi32>
    %11 = arith.remsi %7, %10 : vector<1x256xi32>
    %c0_i32_5 = arith.constant 0 : i32
    %12 = vector.broadcast %c0_i32_5 : i32 to vector<1x256xi32>
    %13 = arith.cmpi ne, %11, %12 : vector<1x256xi32>
    %c0_i32_6 = arith.constant 0 : i32
    %14 = vector.broadcast %c0_i32_6 : i32 to vector<1x256xi32>
    %15 = arith.cmpi slt, %11, %14 : vector<1x256xi32>
    %c0_i32_7 = arith.constant 0 : i32
    %16 = arith.cmpi slt, %9, %c0_i32_7 : i32
    %17 = vector.broadcast %16 : i1 to vector<1x256xi1>
    %18 = vector.broadcast %17 : vector<1x256xi1> to vector<1x256xi1>
    %19 = arith.xori %15, %18 : vector<1x256xi1>
    %20 = arith.andi %19, %13 : vector<1x256xi1>
    %21 = vector.broadcast %9 : i32 to vector<1x256xi32>
    %22 = arith.addi %11, %21 : vector<1x256xi32>
    %23 = arith.select %20, %22, %11 : vector<1x256xi1>, vector<1x256xi32>
    %c0_i32_8 = arith.constant 0 : i32
    %24 = vector.broadcast %c0_i32_8 : i32 to vector<1x256xi32>
    %25 = arith.cmpi ne, %23, %24 : vector<1x256xi32>
    %26 = arith.extui %25 : vector<1x256xi1> to vector<1x256xi32>
    %27 = arith.sitofp %26 : vector<1x256xi32> to vector<1x256xf32>
    %c15_i32 = arith.constant 15 : i32
    %28 = vector.broadcast %c15_i32 : i32 to vector<1x256xi32>
    %29 = arith.cmpi ne, %23, %28 : vector<1x256xi32>
    %30 = arith.extui %29 : vector<1x256xi1> to vector<1x256xi32>
    %31 = arith.sitofp %30 : vector<1x256xi32> to vector<1x256xf32>
    %32 = vector.broadcast %31 : vector<1x256xf32> to vector<4x256xf32>
    %33 = arith.mulf %4, %32 : vector<4x256xf32>
    %34 = vector.broadcast %27 : vector<1x256xf32> to vector<4x256xf32>
    %35 = arith.mulf %4, %34 : vector<4x256xf32>
    %cst_9 = arith.constant 0.000000e+00 : f32
    %36 = vector.broadcast %cst_9 : f32 to vector<4x17xf32>
    %37 = tpu.concatenate %36, %33, %36 in 1 : vector<4x17xf32>, vector<4x256xf32>, vector<4x17xf32> -> vector<4x290xf32>
    %cst_10 = arith.constant 0.000000e+00 : f32
    %38 = vector.broadcast %cst_10 : f32 to vector<4x17xf32>
    %39 = tpu.concatenate %38, %4, %38 in 1 : vector<4x17xf32>, vector<4x256xf32>, vector<4x17xf32> -> vector<4x290xf32>
    %cst_11 = arith.constant 0.000000e+00 : f32
    %40 = vector.broadcast %cst_11 : f32 to vector<4x17xf32>
    %41 = tpu.concatenate %40, %35, %40 in 1 : vector<4x17xf32>, vector<4x256xf32>, vector<4x17xf32> -> vector<4x290xf32>
    %42 = arith.mulf %6, %31 : vector<1x256xf32>
    %cst_12 = arith.constant 0.000000e+00 : f32
    %43 = vector.broadcast %cst_12 : f32 to vector<1x17xf32>
    %44 = tpu.concatenate %43, %42, %43 in 1 : vector<1x17xf32>, vector<1x256xf32>, vector<1x17xf32> -> vector<1x290xf32>
    %cst_13 = arith.constant 0.000000e+00 : f32
    %45 = vector.broadcast %cst_13 : f32 to vector<1x17xf32>
    %46 = tpu.concatenate %45, %6, %45 in 1 : vector<1x17xf32>, vector<1x256xf32>, vector<1x17xf32> -> vector<1x290xf32>
    %47 = arith.mulf %6, %27 : vector<1x256xf32>
    %cst_14 = arith.constant 0.000000e+00 : f32
    %48 = vector.broadcast %cst_14 : f32 to vector<1x17xf32>
    %49 = tpu.concatenate %48, %47, %48 in 1 : vector<1x17xf32>, vector<1x256xf32>, vector<1x17xf32> -> vector<1x290xf32>
    %cst_15 = arith.constant 0.000000e+00 : f32
    %50 = vector.broadcast %cst_15 : f32 to vector<1x256xf32>
    %51 = vector.extract_strided_slice %37 {offsets = [0, 0], sizes = [4, 256], strides = [1, 1]} : vector<4x290xf32> to vector<4x256xf32>
    %52 = vector.extract_strided_slice %44 {offsets = [0, 0], sizes = [1, 256], strides = [1, 1]} : vector<1x290xf32> to vector<1x256xf32>
    %53 = arith.addf %50, %52 : vector<1x256xf32>
    %54 = vector.extract_strided_slice %39 {offsets = [0, 1], sizes = [4, 256], strides = [1, 1]} : vector<4x290xf32> to vector<4x256xf32>
    %55 = vector.extract_strided_slice %46 {offsets = [0, 1], sizes = [1, 256], strides = [1, 1]} : vector<1x290xf32> to vector<1x256xf32>
    %56 = arith.addf %53, %55 : vector<1x256xf32>
    %57 = vector.extract_strided_slice %41 {offsets = [0, 2], sizes = [4, 256], strides = [1, 1]} : vector<4x290xf32> to vector<4x256xf32>
    %58 = vector.extract_strided_slice %49 {offsets = [0, 2], sizes = [1, 256], strides = [1, 1]} : vector<1x290xf32> to vector<1x256xf32>
    %59 = arith.addf %56, %58 : vector<1x256xf32>
    %60 = vector.extract_strided_slice %37 {offsets = [0, 16], sizes = [4, 256], strides = [1, 1]} : vector<4x290xf32> to vector<4x256xf32>
    %61 = vector.extract_strided_slice %44 {offsets = [0, 16], sizes = [1, 256], strides = [1, 1]} : vector<1x290xf32> to vector<1x256xf32>
    %62 = arith.addf %59, %61 : vector<1x256xf32>
    %63 = vector.extract_strided_slice %39 {offsets = [0, 17], sizes = [4, 256], strides = [1, 1]} : vector<4x290xf32> to vector<4x256xf32>
    %64 = vector.extract_strided_slice %46 {offsets = [0, 17], sizes = [1, 256], strides = [1, 1]} : vector<1x290xf32> to vector<1x256xf32>
    %65 = arith.addf %62, %64 : vector<1x256xf32>
    %66 = vector.extract_strided_slice %41 {offsets = [0, 18], sizes = [4, 256], strides = [1, 1]} : vector<4x290xf32> to vector<4x256xf32>
    %67 = vector.extract_strided_slice %49 {offsets = [0, 18], sizes = [1, 256], strides = [1, 1]} : vector<1x290xf32> to vector<1x256xf32>
    %68 = arith.addf %65, %67 : vector<1x256xf32>
    %69 = vector.extract_strided_slice %37 {offsets = [0, 32], sizes = [4, 256], strides = [1, 1]} : vector<4x290xf32> to vector<4x256xf32>
    %70 = vector.extract_strided_slice %44 {offsets = [0, 32], sizes = [1, 256], strides = [1, 1]} : vector<1x290xf32> to vector<1x256xf32>
    %71 = arith.addf %68, %70 : vector<1x256xf32>
    %72 = vector.extract_strided_slice %39 {offsets = [0, 33], sizes = [4, 256], strides = [1, 1]} : vector<4x290xf32> to vector<4x256xf32>
    %73 = vector.extract_strided_slice %46 {offsets = [0, 33], sizes = [1, 256], strides = [1, 1]} : vector<1x290xf32> to vector<1x256xf32>
    %74 = arith.addf %71, %73 : vector<1x256xf32>
    %75 = vector.extract_strided_slice %41 {offsets = [0, 34], sizes = [4, 256], strides = [1, 1]} : vector<4x290xf32> to vector<4x256xf32>
    %76 = vector.extract_strided_slice %49 {offsets = [0, 34], sizes = [1, 256], strides = [1, 1]} : vector<1x290xf32> to vector<1x256xf32>
    %77 = arith.addf %74, %76 : vector<1x256xf32>
    %78 = tpu.concatenate %51, %54, %57, %60, %63, %66, %69, %72, %75 in 0 : vector<4x256xf32>, vector<4x256xf32>, vector<4x256xf32>, vector<4x256xf32>, vector<4x256xf32>, vector<4x256xf32>, vector<4x256xf32>, vector<4x256xf32>, vector<4x256xf32> -> vector<36x256xf32>
    %c0_16 = arith.constant 0 : index
    %c0_17 = arith.constant 0 : index
    %79 = vector.load %arg3[%c0_16, %c0_17] : memref<8x36xf32, #tpu.memory_space<vmem>>, vector<8x36xf32>
    %cst_18 = arith.constant dense<0.000000e+00> : vector<8x256xf32>
    %80 = tpu.matmul %79, %78, %cst_18 {dimension_numbers = #tpu.dot_dimension_numbers<[1], [0], [0], [1], [0, 0, 1, 1], [], []>} : vector<8x36xf32>, vector<36x256xf32>, vector<8x256xf32> -> vector<8x256xf32>
    %c0_19 = arith.constant 0 : index
    %c0_20 = arith.constant 0 : index
    %81 = vector.load %arg4[%c0_19, %c0_20] : memref<8x1xf32, #tpu.memory_space<vmem>>, vector<8x1xf32>
    %82 = vector.broadcast %81 : vector<8x1xf32> to vector<8x256xf32>
    %83 = arith.addf %80, %82 : vector<8x256xf32>
    %cst_21 = arith.constant 0.000000e+00 : f32
    %cst_22 = arith.constant 1.000000e+00 : f32
    %84 = vector.broadcast %cst_21 : f32 to vector<1x256xf32>
    %85 = arith.maximumf %84, %77 : vector<1x256xf32>
    %86 = vector.broadcast %cst_22 : f32 to vector<1x256xf32>
    %87 = arith.minimumf %86, %85 : vector<1x256xf32>
    %cst_23 = arith.constant 9.99999993E-9 : f32
    %88 = vector.broadcast %cst_23 : f32 to vector<1x256xf32>
    %89 = arith.addf %77, %88 : vector<1x256xf32>
    %90 = tpu.reciprocal %89 : vector<1x256xf32> -> vector<1x256xf32>
    %cst_24 = arith.constant 9.000000e+00 : f32
    %91 = vector.broadcast %cst_24 : f32 to vector<1x256xf32>
    %92 = arith.mulf %91, %90 : vector<1x256xf32>
    %93 = arith.mulf %92, %87 : vector<1x256xf32>
    %94 = vector.broadcast %93 : vector<1x256xf32> to vector<8x256xf32>
    %95 = arith.mulf %83, %94 : vector<8x256xf32>
    %96 = vector.shape_cast %95 : vector<8x256xf32> to vector<1x8x256xf32>
    %c0_25 = arith.constant 0 : index
    %c0_26 = arith.constant 0 : index
    %c0_27 = arith.constant 0 : index
    %97 = vector.load %arg5[%c0_25, %c0_26, %c0_27] : memref<1x8x256xf32, #tpu.memory_space<vmem>>, vector<1x8x256xf32>
    tpu.vector_store %arg5[%c0_25, %c0_26, %c0_27], %96 {strides = array<i32>} : memref<1x8x256xf32, #tpu.memory_space<vmem>>, vector<1x8x256xf32>,
    %98 = vector.shape_cast %87 : vector<1x256xf32> to vector<1x1x256xf32>
    %c0_28 = arith.constant 0 : index
    %c0_29 = arith.constant 0 : index
    %c0_30 = arith.constant 0 : index
    %99 = vector.load %arg6[%c0_28, %c0_29, %c0_30] : memref<1x1x256xf32, #tpu.memory_space<vmem>>, vector<1x1x256xf32>
    tpu.vector_store %arg6[%c0_28, %c0_29, %c0_30], %98 {strides = array<i32>} : memref<1x1x256xf32, #tpu.memory_space<vmem>>, vector<1x1x256xf32>,
    return
  }
  func.func @transform_0(%arg0: i32) -> (i32, i32, i32) {
    %c0_i32 = arith.constant 0 : i32
    %c0_i32_0 = arith.constant 0 : i32
    %c0_i32_1 = arith.constant 0 : i32
    return %arg0, %c0_i32, %c0_i32_0 : i32, i32, i32
  }
  func.func @transform_1(%arg0: i32) -> (i32, i32, i32) {
    %c0_i32 = arith.constant 0 : i32
    %c0_i32_0 = arith.constant 0 : i32
    %c0_i32_1 = arith.constant 0 : i32
    return %arg0, %c0_i32, %c0_i32_0 : i32, i32, i32
  }
  func.func @transform_2(%arg0: i32) -> (i32, i32) {
    %c0_i32 = arith.constant 0 : i32
    %c0_i32_0 = arith.constant 0 : i32
    %c0_i32_1 = arith.constant 0 : i32
    return %c0_i32, %c0_i32_0 : i32, i32
  }
  func.func @transform_3(%arg0: i32) -> (i32, i32) {
    %c0_i32 = arith.constant 0 : i32
    %c0_i32_0 = arith.constant 0 : i32
    %c0_i32_1 = arith.constant 0 : i32
    return %c0_i32, %c0_i32_0 : i32, i32
  }
  func.func @transform_4(%arg0: i32) -> (i32, i32, i32) {
    %c0_i32 = arith.constant 0 : i32
    %c0_i32_0 = arith.constant 0 : i32
    %c0_i32_1 = arith.constant 0 : i32
    return %arg0, %c0_i32, %c0_i32_0 : i32, i32, i32
  }
  func.func @transform_5(%arg0: i32) -> (i32, i32, i32) {
    %c0_i32 = arith.constant 0 : i32
    %c0_i32_0 = arith.constant 0 : i32
    %c0_i32_1 = arith.constant 0 : i32
    return %arg0, %c0_i32, %c0_i32_0 : i32, i32, i32
  }
}

</mosaic_0001>

<bundles_post_ra>
// kernel: tpu_custom_call.1
= control target key start
LH: loop header
LB: loop body
LE: loop exit
PB: predicated region body
PF: predicated region fallthrough
CT: control target
= control target key end

     0   :  { %s1621_s0 = inlined_call_operand.hbm [shape: f32[2,4,256], index: 0, kind: input, shape index: {}]   ;;  %s1622_s1 = inlined_call_operand.hbm [shape: f32[2,4,256], index: 1, kind: input, shape index: {}]   ;;  %s1623_s2 = inlined_call_operand.vmem [shape: f32[8,36], index: 2, kind: input, shape index: {}]   ;;  %s1624_s3 = inlined_call_operand.vmem [shape: f32[8,1], index: 3, kind: input, shape index: {}]   ;;  %s1625_s4 = inlined_call_operand.hbm [shape: f32[2,8,256], index: 4, kind: output, shape index: {0}]   ;;  %s1626_s5 = inlined_call_operand.hbm [shape: f32[2,1,256], index: 5, kind: output, shape index: {1}]  }
   0x1   :  { %1627 = sst [smem:[#allocation15_spill]] %s1621_s0 }
   0x2   :  { %11 = vsyncpa [#allocation3], 0 }
   0x3   :  { %13 = vsyncpa [#allocation3 + $0x1], 0 }
   0x4   :  { %14 = vsyncpa [#allocation6], 0 }
   0x5   :  { %16 = vsyncpa [#allocation6 + $0x1], 0 }
   0x6   :  { %17 = vsyncpa [#allocation4], 0 }
   0x7   :  { %19 = vsyncpa [#allocation4 + $0x1], 0 }
   0x8   :  { %20 = vsyncpa [#allocation9], 0 }
   0x9   :  { %22 = vsyncpa [#allocation9 + $0x1], 0  ;;  %s1287_s18 = smov 0   ;;  %s1289_s19 = smov 0  }
   0xa   :  { %s1291_s20 = smov 0   ;;  %s1293_s21 = smov 0  }
   0xb LB: > { %s1308_s22 = sadd.s32 4294967295, %s1244_s21   ;;  %s933_s23 = sadd.s32 4294967294, %s1244_s21   ;;  %s1244_s21 = sphi %s1293_s21, %s1641_s21   ;;  %s1240_s20 = sphi %s1291_s20, %s1640_s20   ;;  %s1236_s19 = sphi %s1289_s19, %s1639_s19   ;;  %s1232_s18 = sphi %s1287_s18, %s1638_s18  }
   0xc   : > { %s1312_s24 = sadd.s32 1, %s1244_s21   ;;  %s35_s25 = sadd.s32 1, %s1240_s20 }
   0xd   : > { %s32_s26 = ssub.s32 %s1244_s21, %s1312_s24  ;;  %p42_p0 = scmp.ne.s32.totalorder %s1240_s20, %s1236_s19 }
   0xe   : > { %p33_p1 = scmp.eq.s32.totalorder %s32_s26, 0  ;;  %p43_p2 = scmp.eq.s32.totalorder %s1244_s21, 0 }
   0xf   : > { %p48_p3 = scmp.ne.s32.totalorder %s1236_s19, %s1232_s18  ;;  %p49_p4 = scmp.eq.s32.totalorder %s1308_s22, 0 }
  0x10   : > { %s1324_s27 = scalar_select %p33_p1, %s1240_s20, %s35_s25  }
  0x11   : > { %p1326_p5 = por %p43_p2, %p42_p0  ;;  %p1330_p6 = por %p49_p4, %p48_p3 }
  0x12   : > { %1628 = sst [smem:[#allocation14_spill]] %s1324_s27  ;;  %p140_p7 = scmp.eq.s32.totalorder %s1308_s22, 1 }
  0x13   : > { %p146_p8 = scmp.eq.s32.totalorder %s933_s23, 1  ;;  %p987_p10 = scmp.lt.s32.totalorder %s1244_s21, 2 }
  0x14   : > { %p1337_p11 = por %p140_p7, %p42_p0  ;;  %s1346_s7 = sand.u32 1, %s1240_s20  }
  0x15   : > { %p1341_p12 = por %p146_p8, %p48_p3  ;;  %s962_s8 = sshll.u32 %s1244_s21, 3 }
  0x16   : > { %s936_s9 = sshll.u32 %s1346_s7, 3  ;;  %s1633_s0 = sld [smem:[#allocation15_spill]] }
  0x17   : > { %s202_s14 = scalar_lea.vmem [#allocation2], %s936_s9  ;;  %p1355_p13 = pnand %p987_p10, %p1326_p5 }
  0x18   : > { %s211_s15 = sshll.u32 %s202_s14, 4  ;;  %p942_p0 = scmp.ge.s32.totalorder %s1244_s21, 1  ;;  %s212_s15 = int_to_ptr.vmem [resolvable:$true] %s211_s15 }
  0x19   : > { %p236_p1 = scmp.lt.s32.totalorder %s1244_s21, 3  ;;  %s199_s17 = scalar_lea.sflag [#allocation3], %s1346_s7 }
  0x1a   : > { %p1086_p3 = pneg %p1355_p13 }
  0x1c   : > { %s207_s12 = scalar_lea.hbm %s1633_s0, %s962_s8  ;;  %s1089_s10 = scalar_lea.hbm %s1633_s0, 16 }
  0x1d   : > { %s209_s13 = sshll.u32 %s207_s12, 4  ;;  %s210_s13 = int_to_ptr.hbm [resolvable:$true] %s209_s13 }
  0x1e   : > { %s1082_s23 = sshra.s32 %s210_s13, 4  ;;  %s1083_s23 = int_to_ptr.hbm [resolvable:$true] %s1082_s23 }
  0x1f   : > { %s1084_s25 = scalar_lea.hbm %s1083_s23, 8  ;;  %p1090_p5 = scmp.lt.s32.totalorder %s1083_s23, %s1633_s0 }
  0x20   : > { %p1085_p2 = scmp.ne.s32.totalorder %s1083_s23, %s1084_s25  ;;  %p1091_p8 = scmp.lt.s32.totalorder %s1089_s10, %s1084_s25 }
  0x22   : > { %p1087_p4 = pnand %p1086_p3, %p1085_p2  ;;  %p1092_p10 = por %p1091_p8, %p1090_p5 }
  0x24   : > { %p1088_p7 = pneg %p1087_p4 }
  0x26   : > { %p1093_p9 = pnand %p1092_p10, %p1088_p7 }
  0x28   : > { %1096 = shalt.err (!%p1093_p9)
}
  0x29   : > { %976 = dma.hbm_to_vmem [thread:$0]  (!%p1355_p13), %s210_s13, 128, %s212_s15, %s199_s17  }
  0x2a   : > { %p1379_p2 = pnand %p942_p0, %p236_p1  ;;  %s227_s23 = scalar_lea.hbm %s1622_s1, %s962_s8 }
  0x2b   : > { %s229_s25 = sshll.u32 %s227_s23, 4  ;;  %s222_s10 = scalar_lea.vmem [#allocation5], %s936_s9  ;;  %s230_s25 = int_to_ptr.hbm [resolvable:$true] %s229_s25 }
  0x2c   : > { %s231_s11 = sshll.u32 %s222_s10, 4  ;;  %s219_s12 = scalar_lea.sflag [#allocation6], %s1346_s7  ;;  %s232_s11 = int_to_ptr.vmem [resolvable:$true] %s231_s11 }
  0x2d   : > { %s1112_s0 = sshra.s32 %s230_s25, 4  ;;  %s1119_s17 = scalar_lea.hbm %s1622_s1, 16  ;;  %s1113_s0 = int_to_ptr.hbm [resolvable:$true] %s1112_s0 }
  0x2e   : > { %s1114_s27 = scalar_lea.hbm %s1113_s0, 8  ;;  %p1120_p4 = scmp.lt.s32.totalorder %s1113_s0, %s1622_s1 }
  0x2f   : > { %p1115_p9 = scmp.ne.s32.totalorder %s1113_s0, %s1114_s27  ;;  %p1121_p7 = scmp.lt.s32.totalorder %s1119_s17, %s1114_s27 }
  0x31   : > { %p1117_p0 = pnand %p1115_p9, %p1086_p3  ;;  %p1122_p5 = por %p1121_p7, %p1120_p4 }
  0x33   : > { %p1118_p1 = pneg %p1117_p0 }
  0x35   : > { %p1123_p8 = pnand %p1122_p5, %p1118_p1 }
  0x37   : > { %1126 = shalt.err (!%p1123_p8)
}
  0x38   : > { %979 = dma.hbm_to_vmem [thread:$0]  (!%p1355_p13), %s230_s25, 128, %s232_s11, %s219_s12  }
  0x39   : > { %240 = sbr.rel (%p1379_p2) target bundleno = 595 (0x253), region = 36  ;;  %s1401_s7 = sand.u32 (!%p1379_p2), 1, %s1236_s19  }
  0x3a   : > { %s943_s9 = sshll.u32 (!%p1379_p2), %s1401_s7, 3  ;;  %s243_s28 = scalar_lea.sflag (!%p1379_p2), [#allocation3], %s1401_s7 }
  0x3b   : > { %s246_s23 = scalar_lea.vmem (!%p1379_p2), [#allocation2], %s943_s9 }
  0x3e   : > { %1215 = dma.done.wait (%p1330_p6), %s243_s28, 128  }
  0x3f   : > { %1217 = vsyncadd (%p1330_p6), %s243_s28, 4294967168  ;;  %s253_s0 = scalar_lea.sflag [#allocation6], %s1401_s7  ;;  %s256_s27 = scalar_lea.vmem [#allocation5], %s943_s9 }
  0x40   : > { %1219 = dma.done.wait (%p1330_p6), %s253_s0, 128  }
  0x41   : > { %1221 = vsyncadd (%p1330_p6), %s253_s0, 4294967168  ;;  %v318_v0 = vlaneseq  ;;  %v294_v5 = vld [vmem:[%s246_s23] sm:$0xff]  ;;  %v295_v6 = vld [vmem:[%s256_s27] sm:$0xff]  ;;  %vm303_vm2 = vcmask 1043456   ;;  %v1246_v8 = vmov 0.0   ;;  %s1247_s29 = smov 17  }
  0x42   : > { %298 = vst [vmem:[#allocation1] ss:$2 sm:$0xff] %v295_v6  ;;  %v296_v7 = vmul.f32 %v295_v6, %v294_v5  ;;  %vm377_vm5 = vcmask 138240   ;;  %s1248_s16 = smov 111   ;;  %s1249_s14 = smov 95   ;;  %vm540_vm6 = vcmask 777216  }
  0x43   : > { %v319_v1 = vand.u32 127, %v318_v0  ;;  %s1250_s25 = smov 96   ;;  %s1251_s10 = smov 94   ;;  %vm527_vm7 = vcmask 785408   ;;  %vm553_vm8 = vcmask 769024   ;;  %vm473_vm9 = vcmask 1031168  }
  0x44   : > { %s1252_s11 = smov 112   ;;  %s1253_s12 = smov 126   ;;  %vm501_vm10 = vcmask 908288   ;;  %vm514_vm11 = vcmask 900096   ;;  %vm488_vm12 = vcmask 916480   ;;  %vm458_vm13 = vcmask 1039360  }
  0x45   : > { %v320_v2 = vadd.s32 128, %v319_v1  ;;  %v325_v3 = vand.u32 15, %v319_v1  ;;  %s1254_s13 = smov 110   ;;  %s1255_s15 = smov 127   ;;  %vm668_vm14 = vcmask 293888   ;;  %vm763_vm15 = vcmask 1040384  }
  0x46   : > { %s959_s28 = sshll.u32 %s1308_s22, 1  ;;  %s946_s23 = sshll.u32 %s1401_s7, 1 }
  0x47   : > { %v332_v4 = vand.u32 15, %v320_v2  ;;  %vm351_vm0 = vcmp.ne.s32.totalorder %v325_v3, 15  ;;  %vm345_vm4 = vcmp.ne.s32.totalorder %v325_v3, 0  ;;  %s1162_s17 = scalar_lea.hbm %s1626_s5, 4 }
  0x48   : > { %v1415_v9 = vsel %vm351_vm0, 1.0, %v1246_v8  ;;  %v1425_v18 = vsel %vm345_vm4, 1.0, %v1246_v8  ;;  %vm768_vm0 = vcmp.lt.s32.totalorder %v318_v0, 256 }
  0x49   : > { %vm352_vm1 = vcmp.ne.s32.totalorder %v332_v4, 15  ;;  %vm346_vm3 = vcmp.ne.s32.totalorder %v332_v4, 0  ;;  %v299_v14 = vld.sshfl [vmem:[#allocation1] sm:$0xff pattern:$0x75316420] }
  0x4a   : > { %v1417_v10 = vsel %vm352_vm1, 1.0, %v1246_v8  ;;  %v300_v15 = vld.sshfl [vmem:[#allocation1 + $0x8] sm:$0xff pattern:$0x75316420]  ;;  %v1422_v16 = vsel %vm346_vm3, 1.0, %v1246_v8  ;;  %v304_v45 = vsel %vm303_vm2, %v299_v14, 0.0 }
  0x4b   : > { %v359_v11 = vrot.slane %v1417_v10, 4  ;;  %v365_v17 = vrot.slane %v1422_v16, 4  ;;  %v305_v51 = vrot.slane %v304_v45, 4  ;;  %v311_v54 = vsel %vm303_vm2, %v300_v15, 0.0 }
  0x4c   : > { %v312_v59 = vrot.slane %v311_v54, 4 }
  0x4d   : > { %v360_v12 = vsel %vm303_vm2, %v1415_v9, %v359_v11  ;;  %v366_v21 = vsel %vm303_vm2, %v1425_v18, %v365_v17  ;;  %v306_v56 = vadd.f32 %v305_v51, %v304_v45 }
  0x4e   : > { %v362_v13 = vmul.f32 %v360_v12, %v296_v7  ;;  %v368_v22 = vmul.f32 %v366_v21, %v296_v7  ;;  %v313_v61 = vadd.f32 %v312_v59, %v311_v54 }
  0x4f   : > { %v307_v60 = vrot.slane %v306_v56, 2 }
  0x50   : > { %370 = vst [vmem:[#allocation1] ss:$2 sm:$0xff] %v362_v13  ;;  %v314_v2 = vrot.slane %v313_v61, 2 }
  0x51   : > { %v308_v63 = vadd.f32 %v307_v60, %v306_v56 }
  0x52   : > { %v315_v6 = vadd.f32 %v314_v2, %v313_v61 }
  0x53   : > { %v309_v3 = vrot.slane %v308_v63, 1 }
  0x54   : > { %v316_v11 = vrot.slane %v315_v6, 1 }
  0x56   : > { %v317_v12 = vadd.f32 %v316_v11, %v315_v6 }
  0x57   : > { %v371_v19 = vld.sshfl [vmem:[#allocation1] sm:$0xff pattern:$0x75316420]  ;;  %v372_v20 = vld.sshfl [vmem:[#allocation1 + $0x8] sm:$0xff pattern:$0x75316420] }
  0x58   : > { %385 = vst [vmem:[#allocation1] ss:$2 sm:$0xff] %v296_v7  ;;  %v1037_v28 = vpack.i.bf16 %v372_v20, %v371_v19  ;;  %v310_v7 = vadd.f32 %v309_v3, %v308_v63  ;;  %v436_v13 = vmul.f32 %v1422_v16, %v317_v12  ;;  %v411_v17 = vmul.f32 %v1417_v10, %v317_v12 }
  0x5a   : > { %v410_v15 = vmul.f32 %v1415_v9, %v310_v7  ;;  %v435_v16 = vmul.f32 %v1425_v18, %v310_v7 }
  0x5f   : > { %v386_v23 = vld.sshfl [vmem:[#allocation1] sm:$0xff pattern:$0x75316420]  ;;  %v387_v24 = vld.sshfl [vmem:[#allocation1 + $0x8] sm:$0xff pattern:$0x75316420] }
  0x60   : > { %v1032_v25 = vpack.i.bf16 %v387_v24, %v386_v23  ;;  %398 = vst [vmem:[#allocation1] ss:$2 sm:$0xff] %v368_v22 }
  0x62   : > { %1033 = vrot.lane.b32.xlu0 %v1032_v25, %s1247_s29 }
  0x67   : > { %v400_v26 = vld.sshfl [vmem:[#allocation1 + $0x8] sm:$0xff pattern:$0x75316420]  ;;  %v399_v27 = vld.sshfl [vmem:[#allocation1] sm:$0xff pattern:$0x75316420] }
  0x68   : > { %403 = vrot.lane.b32.xlu1 %v400_v26, %s1247_s29 }
  0x6a   : > { %401 = vrot.lane.b32.xlu0 %v399_v27, %s1247_s29 }
  0x70   : > { %1038 = vrot.lane.b32.xlu1 %v1037_v28, %s1247_s29 }
  0xd4   : > { %v1034_v29 = vpop.permute.xlu0 %1033 }
  0xd5   : > { %v1036_v30 = vunpack.i.h.bf16 %v1034_v29  ;;  %v1035_v31 = vunpack.i.l.bf16 %v1034_v29 }
  0xd7   : > { %v392_v32 = vsel %vm377_vm5, %v1035_v31, %v1036_v30  ;;  %v395_v33 = vsel %vm377_vm5, 0.0, %v1035_v31  ;;  %v1436_v34 = vsel %vm377_vm5, %v1036_v30, 0.0 }
  0xd8   : > { %v562_v35 = vrot.slane %v395_v33, 4  ;;  %606 = vrot.lane.b32.xlu0 %v1436_v34, %s1248_s16  ;;  %v563_v36 = vrot.slane %v392_v32, 4  ;;  %v564_v57 = vrot.slane %v1436_v34, 4  ;;  %v1052_v62 = vpack.i.bf16 %v392_v32, %v395_v33 }
  0xda   : > { %v404_v37 = vpop.permute.xlu1 %403  ;;  %v1057_v38 = vpack.i.bf16 %v563_v36, %v562_v35 }
  0xdb   : > { %v409_v47 = vsel %vm377_vm5, %v404_v37, 0.0 }
  0xdc   : > { %v402_v48 = vpop.permute.xlu0 %401  ;;  %v614_v14 = vrot.slane %v409_v47, 4 }
  0xdd   : > { %v405_v52 = vsel %vm377_vm5, %v402_v48, %v404_v37  ;;  %v408_v53 = vsel %vm377_vm5, 0.0, %v402_v48 }
  0xde   : > { %v1062_v58 = vpack.i.bf16 %v405_v52, %v408_v53  ;;  %v612_v4 = vrot.slane %v408_v53, 4  ;;  %v613_v5 = vrot.slane %v405_v52, 4 }
  0xe0   : > { %1058 = vrot.lane.b32.xlu0 %v1057_v38, %s1249_s14  ;;  %v1067_v8 = vpack.i.bf16 %v613_v5, %v612_v4 }
  0xe2   : > { %v1039_v39 = vpop.permute.xlu1 %1038 }
  0xe3   : > { %v1041_v40 = vunpack.i.h.bf16 %v1039_v39  ;;  %v1040_v41 = vunpack.i.l.bf16 %v1039_v39 }
  0xe5   : > { %v1442_v42 = vsel %vm377_vm5, 0.0, %v1040_v41  ;;  %v383_v43 = vsel %vm377_vm5, %v1041_v40, 0.0  ;;  %v1446_v44 = vsel %vm377_vm5, %v1040_v41, %v1041_v40 }
  0xe6   : > { %629 = vrot.lane.b32.xlu2 %v383_v43, %s1250_s25  ;;  %v1042_v46 = vpack.i.bf16 %v1446_v44, %v1442_v42  ;;  %v589_v49 = vrot.slane %v1442_v42, 4  ;;  %v590_v50 = vrot.slane %v1446_v44, 4  ;;  %v591_v1 = vrot.slane %v383_v43, 4 }
  0xe8   : > { %1043 = vrot.lane.b32.xlu1 %v1042_v46, %s1250_s25  ;;  %649 = vrot.lane.b32.xlu0 %v409_v47, %s1251_s10  ;;  %v1047_v55 = vpack.i.bf16 %v590_v50, %v589_v49 }
  0xee   : > { %1048 = vrot.lane.b32.xlu2 %v1047_v55, %s1252_s11 }
  0xf0   : > { %639 = vrot.lane.b32.xlu1 %v564_v57, %s1249_s14  ;;  %1063 = vrot.lane.b32.xlu0 %v1062_v58, %s1253_s12 }
  0xf6   : > { %1053 = vrot.lane.b32.xlu2 %v1052_v62, %s1248_s16 }
  0xf8   : > { %581 = vrot.lane.b32.xlu1 %v409_v47, %s1253_s12  ;;  %596 = vrot.lane.b32.xlu0 %v591_v1, %s1252_s11 }
  0xfe   : > { %645 = vrot.lane.b32.xlu2 %v408_v53, %s1251_s10 }
 0x100   : > { %1068 = vrot.lane.b32.xlu1 %v1067_v8, %s1254_s13  ;;  %426 = vrot.lane.b32.xlu0 %v310_v7, %s1247_s29 }
 0x106   : > { %647 = vrot.lane.b32.xlu2 %v405_v52, %s1251_s10 }
 0x108   : > { %1073 = vrot.lane.b32.xlu1 %v1057_v38, %s1255_s15  ;;  %441 = vrot.lane.b32.xlu0 %v436_v13, %s1247_s29 }
 0x10e   : > { %619 = vrot.lane.b32.xlu2 %v614_v14, %s1254_s13 }
 0x110   : > { %428 = vrot.lane.b32.xlu1 %v317_v12, %s1247_s29 }
 0x116   : > { %569 = vrot.lane.b32.xlu2 %v564_v57, %s1255_s15 }
 0x118   : > { %414 = vrot.lane.b32.xlu1 %v410_v15, %s1247_s29 }
 0x11e   : > { %439 = vrot.lane.b32.xlu2 %v435_v16, %s1247_s29 }
 0x126   : > { %416 = vrot.lane.b32.xlu2 %v411_v17, %s1247_s29  ;;  %s802_s29 = scalar_lea.hbm %s1626_s5, %s959_s28 }
 0x140   : > { %v630_v19 = vpop.permute.xlu2 %629 }
 0x148   : > { %v1049_v20 = vpop.permute.xlu2 %1048 }
 0x149   : > { %v1051_v49 = vunpack.i.h.bf16 %v1049_v20  ;;  %v1050_v52 = vunpack.i.l.bf16 %v1049_v20 }
 0x14a   : > { %v607_v21 = vpop.permute.xlu0 %606 }
 0x14b   : > { %v598_v2 = vsel %vm488_vm12, %v1050_v52, %v1051_v49 }
 0x150   : > { %v1054_v22 = vpop.permute.xlu2 %1053 }
 0x151   : > { %v1056_v43 = vunpack.i.h.bf16 %v1054_v22  ;;  %v1055_v45 = vunpack.i.l.bf16 %v1054_v22 }
 0x152   : > { %v1059_v23 = vpop.permute.xlu0 %1058 }
 0x153   : > { %v1061_v26 = vunpack.i.h.bf16 %v1059_v23  ;;  %v1060_v27 = vunpack.i.l.bf16 %v1059_v23  ;;  %v608_v56 = vsel %vm501_vm10, %v1055_v45, %v1056_v43  ;;  %v609_v57 = vsel %vm501_vm10, %v1056_v43, %v607_v21 }
 0x155   : > { %v641_v30 = vsel %vm540_vm6, %v1060_v27, %v1061_v26  ;;  %v662_v27 = vld [vmem:[%s1624_s3] sm:$0xff] }
 0x158   : > { %v646_v24 = vpop.permute.xlu2 %645 }
 0x15a   : > { %v1044_v25 = vpop.permute.xlu1 %1043  ;;  %v650_v9 = vpop.permute.xlu0 %649 }
 0x15b   : > { %v1046_v28 = vunpack.i.h.bf16 %v1044_v25  ;;  %v1045_v29 = vunpack.i.l.bf16 %v1044_v25 }
 0x15d   : > { %v631_v10 = vsel %vm527_vm7, %v1045_v29, %v1046_v28  ;;  %v632_v37 = vsel %vm527_vm7, %v1046_v28, %v630_v19 }
 0x15e   : > { %v659_v36 = vsel %vm303_vm2, %v631_v10, %v641_v30 }
 0x160   : > { %v648_v18 = vpop.permute.xlu2 %647 }
 0x161   : > { %v651_v31 = vsel %vm553_vm8, %v646_v24, %v648_v18  ;;  %v652_v32 = vsel %vm553_vm8, %v648_v18, %v650_v9  ;;  %v661_v9 = vld [vmem:[%s1623_s2] sm:$0xff] }
 0x162   : > { %v640_v33 = vpop.permute.xlu1 %639  ;;  %951 = vmatpush.msk.msra.mxu0 %vm303_vm2, %v651_v31  ;;  %953 = vmatpush.msk.msra.mxu1 %vm303_vm2, %v652_v32  ;;  %v1064_v34 = vpop.permute.xlu0 %1063 }
 0x163   : > { %v642_v35 = vsel %vm540_vm6, %v1061_v26, %v640_v33  ;;  %v1066_v46 = vunpack.i.h.bf16 %v1064_v34  ;;  %v1065_v47 = vunpack.i.l.bf16 %v1064_v34  ;;  %v1256_v26 = vmov 0  }
 0x164   : > { %688 = vmatpush.msra.mxu0 %v659_v36  ;;  %v660_v38 = vsel %vm303_vm2, %v632_v37, %v642_v35  ;;  %1077 = vset.pattern.permute.xlu0 %v1256_v26 }
 0x165   : > { %708 = vmatpush.msra.mxu1 %v660_v38  ;;  %v583_v58 = vsel %vm473_vm9, %v1065_v47, %v1066_v46 }
 0x166   : > { %v655_v3 = vsel %vm303_vm2, %v583_v58, %v598_v2 }
 0x168   : > { %v620_v39 = vpop.permute.xlu2 %619 }
 0x16a   : > { %v582_v40 = vpop.permute.xlu1 %581  ;;  %v597_v41 = vpop.permute.xlu0 %596 }
 0x16b   : > { %v584_v59 = vsel %vm473_vm9, %v1066_v46, %v582_v40  ;;  %v599_v60 = vsel %vm488_vm12, %v1051_v49, %v597_v41 }
 0x16c   : > { %v656_v4 = vsel %vm303_vm2, %v584_v59, %v599_v60 }
 0x170   : > { %v570_v48 = vpop.permute.xlu2 %569 }
 0x172   : > { %v1069_v50 = vpop.permute.xlu1 %1068  ;;  %v427_v51 = vpop.permute.xlu0 %426 }
 0x173   : > { %v1071_v53 = vunpack.i.h.bf16 %v1069_v50  ;;  %v1070_v54 = vunpack.i.l.bf16 %v1069_v50  ;;  %v433_v55 = vsel %vm377_vm5, 0.0, %v427_v51 }
 0x174   : > { %452 = vrot.lane.b32.xlu0 %v433_v55, %s1255_s15 }
 0x175   : > { %v621_v61 = vsel %vm514_vm11, %v1070_v54, %v1071_v53  ;;  %v622_v62 = vsel %vm514_vm11, %v1071_v53, %v620_v39 }
 0x176   : > { %v657_v63 = vsel %vm303_vm2, %v608_v56, %v621_v61  ;;  %v658_v1 = vsel %vm303_vm2, %v609_v57, %v622_v62 }
 0x177   : > { %689 = vmatpush.msra.mxu0 %v657_v63  ;;  %709 = vmatpush.msra.mxu1 %v658_v1 }
 0x178   : > { %v440_v5 = vpop.permute.xlu2 %439 }
 0x179   : > { %690 = vmatpush.msra.mxu0 %v655_v3  ;;  %710 = vmatpush.msra.mxu1 %v656_v4  ;;  %v446_v6 = vsel %vm377_vm5, 0.0, %v440_v5 }
 0x17a   : > { %v1074_v7 = vpop.permute.xlu1 %1073  ;;  %v442_v20 = vpop.permute.xlu0 %441 }
 0x17b   : > { %v1076_v8 = vunpack.i.h.bf16 %v1074_v7  ;;  %v1075_v11 = vunpack.i.l.bf16 %v1074_v7  ;;  %v447_v21 = vsel %vm377_vm5, %v442_v20, 0.0 }
 0x17c   : > { %467 = vrot.lane.b32.xlu0 %v446_v6, %s1253_s12 }
 0x17d   : > { %v571_v12 = vsel %vm458_vm13, %v1075_v11, %v1076_v8  ;;  %v572_v13 = vsel %vm458_vm13, %v1076_v8, %v570_v48 }
 0x17e   : > { %v653_v14 = vsel %vm303_vm2, %v1442_v42, %v571_v12  ;;  %v654_v15 = vsel %vm303_vm2, %v1446_v44, %v572_v13  ;;  %v443_v42 = vsel %vm377_vm5, %v440_v5, %v442_v20 }
 0x17f   : > { %691 = vmatpush.msra.mxu0 %v653_v14  ;;  %711 = vmatpush.msra.mxu1 %v654_v15 }
 0x180   : > { %v417_v44 = vpop.permute.xlu2 %416  ;;  %952 = vmatmul.msk.f32.vlgmr.msra.gmra.mxu0 %vm668_vm14, %v661_v9  ;;  %954 = vmatmul.msk.f32.vlgmr.msra.gmra.mxu1 %vm668_vm14, %v661_v9 }
 0x181   : > { %v423_v24 = vsel %vm377_vm5, %v417_v44, 0.0 }
 0x182   : > { %v429_v16 = vpop.permute.xlu1 %428 }
 0x183   : > { %v434_v17 = vsel %vm377_vm5, %v429_v16, 0.0  ;;  %v430_v19 = vsel %vm377_vm5, %v427_v51, %v429_v16 }
 0x184   : > { %456 = vrot.lane.b32.xlu2 %v434_v17, %s1255_s15  ;;  %454 = vrot.lane.b32.xlu1 %v430_v19, %s1255_s15 }
 0x18a   : > { %v415_v22 = vpop.permute.xlu1 %414 }
 0x18b   : > { %v422_v23 = vsel %vm377_vm5, 0.0, %v415_v22  ;;  %v418_v25 = vsel %vm377_vm5, %v415_v22, %v417_v44 }
 0x18c   : > { %482 = vrot.lane.b32.xlu0 %v422_v23, %s1252_s11  ;;  %471 = vrot.lane.b32.xlu2 %v447_v21, %s1253_s12 }
 0x18d   : > { %469 = vrot.lane.b32.xlu1 %v443_v42, %s1253_s12 }
 0x194   : > { %495 = vrot.lane.b32.xlu0 %v433_v55, %s1248_s16  ;;  %486 = vrot.lane.b32.xlu2 %v423_v24, %s1252_s11 }
 0x195   : > { %484 = vrot.lane.b32.xlu1 %v418_v25, %s1252_s11 }
 0x19c   : > { %508 = vrot.lane.b32.xlu0 %v446_v6, %s1254_s13  ;;  %499 = vrot.lane.b32.xlu2 %v434_v17, %s1248_s16 }
 0x19d   : > { %497 = vrot.lane.b32.xlu1 %v430_v19, %s1248_s16  ;;  %s293_s16 = scalar_lea.vmem [#allocation8], %s946_s23 }
 0x1a4   : > { %521 = vrot.lane.b32.xlu0 %v422_v23, %s1250_s25  ;;  %512 = vrot.lane.b32.xlu2 %v447_v21, %s1254_s13 }
 0x1a5   : > { %510 = vrot.lane.b32.xlu1 %v443_v42, %s1254_s13 }
 0x1ac   : > { %534 = vrot.lane.b32.xlu0 %v433_v55, %s1249_s14  ;;  %525 = vrot.lane.b32.xlu2 %v423_v24, %s1250_s25 }
 0x1ad   : > { %523 = vrot.lane.b32.xlu1 %v418_v25, %s1250_s25  ;;  %s806_s25 = sshll.u32 %s802_s29, 4  ;;  %s807_s25 = int_to_ptr.hbm [resolvable:$true] %s806_s25 }
 0x1ae   : > { %s1156_s11 = sshra.s32 %s807_s25, 4  ;;  %s1157_s11 = int_to_ptr.hbm [resolvable:$true] %s1156_s11 }
 0x1af   : > { %s1158_s12 = scalar_lea.hbm %s1157_s11, 2  ;;  %p1163_p10 = scmp.lt.s32.totalorder %s1157_s11, %s1626_s5 }
 0x1b0   : > { %p1159_p6 = scmp.ne.s32.totalorder %s1157_s11, %s1158_s12  ;;  %p1164_p2 = scmp.lt.s32.totalorder %s1162_s17, %s1158_s12 }
 0x1b2   : > { %p1160_p13 = pnand %p1159_p6, %p1337_p11  ;;  %p1165_p9 = por %p1164_p2, %p1163_p10 }
 0x1b4   : > { %547 = vrot.lane.b32.xlu0 %v446_v6, %s1251_s10  ;;  %538 = vrot.lane.b32.xlu2 %v434_v17, %s1249_s14  ;;  %p1161_p3 = pneg %p1160_p13 }
 0x1b5   : > { %536 = vrot.lane.b32.xlu1 %v430_v19, %s1249_s14  ;;  %s804_s14 = sshll.u32 %s293_s16, 4  ;;  %s805_s14 = int_to_ptr.vmem [resolvable:$true] %s804_s14 }
 0x1b6   : > { %p1166_p0 = pnand %p1165_p9, %p1161_p3 }
 0x1bc   : > { %551 = vrot.lane.b32.xlu2 %v447_v21, %s1251_s10  ;;  %665 = vperm.xlu0 %1077, %v662_v27  }
 0x1bd   : > { %549 = vrot.lane.b32.xlu1 %v443_v42, %s1251_s10  ;;  %s777_s10 = scalar_lea.sflag [#allocation9], %s1401_s7 }
 0x1de   : > { %v457_v28 = vpop.permute.xlu2 %456 }
 0x1e6   : > { %v453_v29 = vpop.permute.xlu0 %452  ;;  %v472_v18 = vpop.permute.xlu2 %471 }
 0x1ee   : > { %v468_v10 = vpop.permute.xlu0 %467  ;;  %v487_v31 = vpop.permute.xlu2 %486 }
 0x1f6   : > { %v455_v30 = vpop.permute.xlu1 %454  ;;  %v500_v34 = vpop.permute.xlu2 %499 }
 0x1f7   : > { %v459_v46 = vsel %vm458_vm13, %v453_v29, %v455_v30  ;;  %v460_v47 = vsel %vm458_vm13, %v455_v30, %v457_v28 }
 0x1f8   : > { %v463_v50 = vadd.f32 %v459_v46, %v422_v23  ;;  %v464_v51 = vadd.f32 %v460_v47, %v418_v25 }
 0x1fe   : > { %v483_v32 = vpop.permute.xlu0 %482  ;;  %v513_v38 = vpop.permute.xlu2 %512 }
 0x1ff   : > { %v470_v33 = vpop.permute.xlu1 %469 }
 0x200   : > { %v474_v48 = vsel %vm473_vm9, %v468_v10, %v470_v33  ;;  %v475_v49 = vsel %vm473_vm9, %v470_v33, %v472_v18 }
 0x201   : > { %v478_v55 = vadd.f32 %v474_v48, %v463_v50  ;;  %v479_v56 = vadd.f32 %v475_v49, %v464_v51 }
 0x206   : > { %v496_v36 = vpop.permute.xlu0 %495  ;;  %v526_v41 = vpop.permute.xlu2 %525 }
 0x207   : > { %v485_v35 = vpop.permute.xlu1 %484 }
 0x208   : > { %v489_v52 = vsel %vm488_vm12, %v483_v32, %v485_v35  ;;  %v490_v53 = vsel %vm488_vm12, %v485_v35, %v487_v31 }
 0x209   : > { %v493_v60 = vadd.f32 %v489_v52, %v478_v55  ;;  %v494_v61 = vadd.f32 %v490_v53, %v479_v56 }
 0x20e   : > { %v509_v39 = vpop.permute.xlu0 %508  ;;  %v539_v54 = vpop.permute.xlu2 %538 }
 0x20f   : > { %v498_v37 = vpop.permute.xlu1 %497 }
 0x210   : > { %v502_v58 = vsel %vm501_vm10, %v496_v36, %v498_v37  ;;  %v503_v59 = vsel %vm501_vm10, %v498_v37, %v500_v34 }
 0x211   : > { %v506_v2 = vadd.f32 %v502_v58, %v493_v60  ;;  %v507_v3 = vadd.f32 %v503_v59, %v494_v61 }
 0x216   : > { %v522_v43 = vpop.permute.xlu0 %521  ;;  %v552_v14 = vpop.permute.xlu2 %551 }
 0x217   : > { %v511_v40 = vpop.permute.xlu1 %510 }
 0x218   : > { %v515_v63 = vsel %vm514_vm11, %v509_v39, %v511_v40  ;;  %v516_v1 = vsel %vm514_vm11, %v511_v40, %v513_v38 }
 0x219   : > { %v519_v6 = vadd.f32 %v515_v63, %v506_v2  ;;  %v520_v7 = vadd.f32 %v516_v1, %v507_v3 }
 0x21e   : > { %v535_v57 = vpop.permute.xlu0 %534 }
 0x21f   : > { %v524_v45 = vpop.permute.xlu1 %523 }
 0x220   : > { %v528_v4 = vsel %vm527_vm7, %v522_v43, %v524_v45  ;;  %v529_v5 = vsel %vm527_vm7, %v524_v45, %v526_v41 }
 0x221   : > { %v532_v12 = vadd.f32 %v528_v4, %v519_v6  ;;  %v533_v13 = vadd.f32 %v529_v5, %v520_v7 }
 0x226   : > { %v548_v17 = vpop.permute.xlu0 %547 }
 0x227   : > { %v537_v62 = vpop.permute.xlu1 %536 }
 0x228   : > { %v541_v8 = vsel %vm540_vm6, %v535_v57, %v537_v62  ;;  %v542_v11 = vsel %vm540_vm6, %v537_v62, %v539_v54 }
 0x229   : > { %v545_v15 = vadd.f32 %v541_v8, %v532_v12  ;;  %v546_v16 = vadd.f32 %v542_v11, %v533_v13 }
 0x22f   : > { %v550_v19 = vpop.permute.xlu1 %549 }
 0x230   : > { %v554_v20 = vsel %vm553_vm8, %v548_v17, %v550_v19  ;;  %v555_v21 = vsel %vm553_vm8, %v550_v19, %v552_v14 }
 0x231   : > { %v558_v22 = vadd.f32 %v554_v20, %v545_v15  ;;  %v559_v42 = vadd.f32 %v555_v21, %v546_v16 }
 0x233   : > { %v716_v23 = vmax.f32 %v558_v22, 0.0  ;;  %v717_v44 = vmax.f32 %v559_v42, 0.0  ;;  %v720_v24 = vadd.f32 1e-08, %v558_v22  ;;  %v721_v25 = vadd.f32 1e-08, %v559_v42 }
 0x235   : > { %v1571_v9 = vmin.f32 %v717_v44, 1.0  ;;  %1078 = vrcp.f32 %v720_v24  ;;  %v718_v26 = vmin.f32 %v716_v23, 1.0 }
 0x236   : > { %1080 = vrcp.f32 %v721_v25 }
 0x237   : > { %v762_v27 = vrot.slane %v1571_v9, 7 }
 0x239   : > { %v764_v28 = vsel %vm763_vm15, %v718_v26, %v762_v27 }
 0x23a   : > { %770 = vst.msk [vmem:[%s293_s16] sm:$0x3] %vm768_vm0, %v764_v28 }
 0x23b   : > { %v1079_v29 = vpop.eup %1078 }
 0x23c   : > { %1169 = shalt.err (!%p1166_p0)
}
 0x23d   : > { %970 = dma.vmem_to_hbm [thread:$0]  (%p1337_p11), %s805_s14, 32, %s807_s25, %s777_s10   ;;  %v1081_v0 = vpop.eup %1080  ;;  %v723_v18 = vmul.f32 %v1079_v29, %v720_v24  ;;  %v733_v32 = vand.u32 2147483648, %v720_v24  ;;  %vm728_vm1 = vweird.f32 %v1079_v29  ;;  %v731_v34 = vand.u32 2147483647, %v720_v24  ;;  %v666_v45 = vpop.permute.xlu0 %665 }
 0x23e   : > { %v737_v10 = vmul.f32 %v1081_v0, %v721_v25  ;;  %v747_v35 = vand.u32 2147483648, %v721_v25  ;;  %vm742_vm2 = vweird.f32 %v1081_v0  ;;  %v745_v37 = vand.u32 2147483647, %v721_v25  ;;  %s945_s9 = sshll.u32 %s1401_s7, 4  ;;  %s964_s28 = sshll.u32 %s1308_s22, 4  ;;  %v693_v46 = vpop.f32.mrf.mxu0  ;;  %v713_v50 = vpop.f32.mrf.mxu1 }
 0x23f   : > { %v724_v30 = vsub.f32 1.0, %v723_v18  ;;  %vm727_vm3 = vweird.f32 %v720_v24  ;;  %v734_v39 = vor.u32 1.1754944e-38, %v733_v32  ;;  %vm741_vm5 = vweird.f32 %v721_v25  ;;  %s788_s27 = scalar_lea.hbm %s1625_s4, %s964_s28  ;;  %s286_s22 = scalar_lea.vmem [#allocation7], %s945_s9 }
 0x240   : > { %v738_v31 = vsub.f32 1.0, %v737_v10  ;;  %vm729_vm4 = vmor %vm727_vm3, %vm728_vm1  ;;  %vm732_vm6 = vcmp.eq.f32.partialorder %v731_v34, 8.507059e+37  ;;  %v748_v43 = vor.u32 1.1754944e-38, %v747_v35  ;;  %vm746_vm8 = vcmp.eq.f32.partialorder %v745_v37, 8.507059e+37  ;;  %s790_s29 = sshll.u32 %s286_s22, 4  ;;  %s792_s16 = sshll.u32 %s788_s27, 4  ;;  %s791_s29 = int_to_ptr.vmem [resolvable:$true] %s790_s29  ;;  %s793_s16 = int_to_ptr.hbm [resolvable:$true] %s792_s16 }
 0x241   : > { %v725_v33 = vmul.f32 %v1079_v29, %v724_v30  ;;  %vm743_vm7 = vmor %vm741_vm5, %vm742_vm2  ;;  %v694_v53 = vadd.f32 %v693_v46, %v666_v45  ;;  %v714_v55 = vadd.f32 %v713_v50, %v666_v45  ;;  %s772_s14 = scalar_lea.sflag [#allocation4], %s1401_s7  ;;  %s1184_s25 = sshra.s32 %s793_s16, 4  ;;  %s1185_s25 = int_to_ptr.hbm [resolvable:$true] %s1184_s25 }
 0x242   : > { %v739_v36 = vmul.f32 %v1081_v0, %v738_v31  ;;  %s1186_s10 = scalar_lea.hbm %s1185_s25, 16  ;;  %s1190_s13 = scalar_lea.hbm %s1625_s4, 32 }
 0x243   : > { %v726_v38 = vadd.f32 %v1079_v29, %v725_v33  ;;  %p1187_p1 = scmp.ne.s32.totalorder %s1185_s25, %s1186_s10  ;;  %p1191_p5 = scmp.lt.s32.totalorder %s1185_s25, %s1625_s4 }
 0x244   : > { %v740_v40 = vadd.f32 %v1081_v0, %v739_v36  ;;  %p1192_p8 = scmp.lt.s32.totalorder %s1190_s13, %s1186_s10 }
 0x245   : > { %v730_v41 = vsel %vm729_vm4, %v1079_v29, %v726_v38  ;;  %p1188_p4 = pnand %p1187_p1, %p1337_p11 }
 0x246   : > { %v735_v47 = vsel %vm732_vm6, %v734_v39, %v730_v41  ;;  %v744_v48 = vsel %vm743_vm7, %v1081_v0, %v740_v40  ;;  %p1193_p6 = por %p1192_p8, %p1191_p5 }
 0x247   : > { %v750_v49 = vmul.f32 9.0, %v735_v47  ;;  %v749_v51 = vsel %vm746_vm8, %v748_v43, %v744_v48  ;;  %p1189_p7 = pneg %p1188_p4 }
 0x248   : > { %v751_v52 = vmul.f32 9.0, %v749_v51 }
 0x249   : > { %v752_v54 = vmul.f32 %v750_v49, %v718_v26  ;;  %p1194_p13 = pnand %p1193_p6, %p1189_p7 }
 0x24a   : > { %v753_v56 = vmul.f32 %v751_v52, %v1571_v9 }
 0x24b   : > { %v754_v57 = vperm.slane %v752_v54, 0 }
 0x24c   : > { %v755_v58 = vperm.slane %v753_v56, 0 }
 0x24d   : > { %v756_v59 = vmul.f32 %v754_v57, %v694_v53 }
 0x24e   : > { %v757_v60 = vmul.f32 %v755_v58, %v714_v55 }
 0x24f   : > { %758 = vst [vmem:[%s286_s22] sm:$0xff] %v756_v59 }
 0x250   : > { %759 = vst [vmem:[%s286_s22 + $0x8] sm:$0xff] %v757_v60 }
 0x251   : > { %1197 = shalt.err (!%p1194_p13)
}
 0x252   : > { %969 = dma.vmem_to_hbm [thread:$0]  (%p1337_p11), %s791_s29, 256, %s793_s16, %s772_s14  }
 0x253 PF: > { %s818_s7 = sand.u32 1, %s1232_s18   ;;  %p1636_p3 = scmp.ge.s32.totalorder %s1244_s21, 2 }
 0x254   : > { %s819_s26 = scalar_lea.sflag [#allocation4], %s818_s7 }
 0x255   : > { %p981_p10 = pnand %p1636_p3, %p1341_p12 }
 0x257   : > { %p982_p2 = pneg %p981_p10 }
 0x259   : > { %1223 = dma.done.wait (%p982_p2), %s819_s26, 256  }
 0x25a   : > { %1225 = vsyncadd (%p982_p2), %s819_s26, 4294967040  ;;  %s829_s8 = scalar_lea.sflag [#allocation9], %s818_s7 }
 0x25b   : > { %1227 = dma.done.wait (%p982_p2), %s829_s8, 32  }
 0x25c   : > { %1229 = vsyncadd (%p982_p2), %s829_s8, 4294967264  ;;  %s1637_s30 = sld [smem:[#allocation14_spill]]  ;;  %p25_p11 = scmp.ge.s32.totalorder %s1312_s24, 4  }
 0x25d   : > { %s1638_s18 = smov %s1236_s19  ;;  %s1639_s19 = smov %s1240_s20 }
 0x25e   : > { %s1641_s21 = smov %s1312_s24  ;;  %27 = sbr.rel (!%p25_p11) target bundleno = 11 (0xb), region = 111 }
 0x262   : > { %s1640_s20 = smov %s1637_s30 }
 0x263   :  { %835 = vsyncpa [#allocation3], 1 }
 0x264   :  { %837 = vsyncpa [#allocation3 + $0x1], 1 }
 0x265   :  { %838 = vsyncpa [#allocation6], 1 }
 0x266   :  { %840 = vsyncpa [#allocation6 + $0x1], 1 }
 0x267   :  { %841 = vsyncpa [#allocation4], 1 }
 0x268   :  { %843 = vsyncpa [#allocation4 + $0x1], 1 }
 0x269   :  { %844 = vsyncpa [#allocation9], 1 }
 0x26a   :  { %846 = vsyncpa [#allocation9 + $0x1], 1 }

</bundles_post_ra>
